<compile_context>
chip_gen: v5e
topology: v5e:2x2
jax: 0.10.0
libtpu: 0.0.40
codegen_flags: <defaults>
</compile_context>

<pallas_src>
import jax
import jax.numpy as jnp
from jax.experimental import pallas as pl
from jax.experimental.pallas import tpu as pltpu

LN_EPS = 1e-5
LANE = 128


def _pe_kernel(p_ref, x_ref, o_ref):
    """p_ref: SMEM f32[C*dim + 3*dim]  -- W (row-major c*dim+d), bias, gamma, beta.
    x_ref: (1, C, ts, 128) input block (NCHW, spatial on lanes).
    o_ref: (1, dim, ts, 128) output block (channels-first)."""
    _, C, ts, _ = x_ref.shape
    dim = o_ref.shape[1]

    # Loop-invariant scalar parameters (SMEM scalar reads -- separate scalar slot).
    w = [[p_ref[c * dim + d] for d in range(dim)] for c in range(C)]
    bias = [p_ref[C * dim + d] for d in range(dim)]
    gamma = [p_ref[(C + 1) * dim + d] for d in range(dim)]
    beta = [p_ref[(C + 2) * dim + d] for d in range(dim)]

    # Strip size: bounds live ranges (C + dim dense (strip,128) f32 tiles live at once,
    # well under 64 vregs) so the large pipelined block never spills.
    if ts % 16 == 0:
        strip = 16
    elif ts % 8 == 0:
        strip = 8
    else:
        strip = ts  # tiny full-extent block (e.g. very small spatial inputs)
    n_strips = ts // strip
    inv_dim = 1.0 / dim

    @pl.loop(0, n_strips)
    def _(i):
        r = pl.multiple_of(i * strip, strip)
        # Per-channel dense tiles; f32 math throughout (v5e VPU has no bf16 ALU).
        x = [x_ref[0, c, pl.ds(r, strip), :].astype(jnp.float32) for c in range(C)]

        # Linear C->dim: scalar * tile FMAs on the VPU (MXU would be <1% utilized at C=4).
        ys = []
        s1 = None  # sum_d y_d
        s2 = None  # sum_d y_d^2  (single accumulation pass for the LN stats)
        for d in range(dim):
            y = x[0] * w[0][d]
            for c in range(1, C):
                y = y + x[c] * w[c][d]
            y = y + bias[d]
            ys.append(y)
            s1 = y if s1 is None else s1 + y
            s2 = y * y if s2 is None else s2 + y * y

        # LayerNorm over dim: elementwise over the dim row planes, biased variance,
        # eps inside the sqrt (matches torch.nn.LayerNorm).  rsqrt goes to the EUP.
        mean = s1 * inv_dim
        var = jnp.maximum(s2 * inv_dim - mean * mean, 0.0)
        rstd = jax.lax.rsqrt(var + LN_EPS)
        for d in range(dim):
            out = (ys[d] - mean) * rstd * gamma[d] + beta[d]
            o_ref[0, d, pl.ds(r, strip), :] = out.astype(o_ref.dtype)


def positional_encoding_layer(feat_nchw, w, b, gamma, beta, *, block_rows=1024):
    """feat_nchw: (B, C, H, W). w: (C, dim) (transposed torch Linear weight),
    b/gamma/beta: (dim,). Returns (B, H, W, dim), matching the PyTorch forward."""
    B, C, H, W = feat_nchw.shape
    dim = w.shape[1]
    S = H * W
    Sr = pl.cdiv(S, LANE)
    S_pad = Sr * LANE

    # NCHW consumed directly; splitting spatial into (Sr, 128) is a free trailing-dim
    # reshape.  Zero-pad only when H*W is not a multiple of 128 (padded columns are
    # independent and sliced off afterwards).
    x = feat_nchw.reshape(B, C, S)
    if S_pad != S:
        x = jnp.pad(x, ((0, 0), (0, 0), (0, S_pad - S)))
    x = x.reshape(B, C, Sr, LANE)

    # 42 scalars packed for SMEM.
    params = jnp.concatenate(
        [w.reshape(-1).astype(jnp.float32),
         b.reshape(-1).astype(jnp.float32),
         gamma.reshape(-1).astype(jnp.float32),
         beta.reshape(-1).astype(jnp.float32)])

    # Block row count: ~5 MB HBM per grid step at the default (amortizes ~0.35us/step),
    # while double-buffered in+out blocks stay ~10 MiB -- well inside the 32 MiB scoped
    # VMEM we request (safe on v5e/v6e/v7x).
    ts = min(block_rows, Sr)
    if ts < Sr:
        ts = max(8, (ts // 8) * 8)  # (8,128) block-shape rule for partial blocks
    grid = (B, pl.cdiv(Sr, ts))

    out = pl.pallas_call(
        _pe_kernel,
        out_shape=jax.ShapeDtypeStruct((B, dim, Sr, LANE), feat_nchw.dtype),
        grid_spec=pltpu.PrefetchScalarGridSpec(
            num_scalar_prefetch=0,
            grid=grid,
            in_specs=[
                pl.BlockSpec(memory_space=pltpu.MemorySpace.SMEM),          # params
                pl.BlockSpec((1, C, ts, LANE), lambda bi, j: (bi, 0, j, 0)),  # activations
            ],
            out_specs=pl.BlockSpec((1, dim, ts, LANE), lambda bi, j: (bi, 0, j, 0)),
        ),
        compiler_params=pltpu.CompilerParams(
            dimension_semantics=("parallel", "parallel"),
            vmem_limit_bytes=32 * 1024 * 1024,
        ),
    )(params, x)

    # Channels-first -> (B, H, W, dim): only the tiny 6-channel output permute is left to XLA.
    # TODO(synk): elide this permute (and halve writeback with a bf16 out dtype) if the
    # downstream consumer accepts channels-first / bf16.
    out = out.reshape(B, dim, S_pad)
    if S_pad != S:
        out = out[:, :, :S]
    return jnp.transpose(out.reshape(B, dim, H, W), (0, 2, 3, 1))


if __name__ == "__main__":
    B, C, H, W = 2, 4, 16, 16
    dim = 6

    key = jax.random.PRNGKey(0)
    k_feat, k_w = jax.random.split(key)

    feat = jax.random.normal(k_feat, (B, C, H, W), dtype=jnp.float32)

    # Parameter init mirroring the PyTorch module:
    #   proj.weight ~ Normal(0, 1e-5), proj.bias = 0, LayerNorm gamma=1, beta=0
    w_torch_shape = jax.random.normal(k_w, (dim, C), dtype=jnp.float32) * 1e-5
    w = w_torch_shape.T                      # (C, dim) for x @ w
    b = jnp.zeros((dim,), dtype=jnp.float32)
    gamma = jnp.ones((dim,), dtype=jnp.float32)
    beta = jnp.zeros((dim,), dtype=jnp.float32)

    out = positional_encoding_layer(feat, w, b, gamma, beta)
    out = jax.block_until_ready(out)

    # Reference check in plain JAX (two-pass LN, exactly the PyTorch forward).
    x_ref = jnp.transpose(feat, (0, 2, 3, 1))
    y_ref = x_ref @ w + b
    mean = jnp.mean(y_ref, axis=-1, keepdims=True)
    var = jnp.mean((y_ref - mean) ** 2, axis=-1, keepdims=True)
    ref = (y_ref - mean) * jax.lax.rsqrt(var + LN_EPS) * gamma + beta

    assert out.shape == (B, H, W, dim)
    assert jnp.allclose(out, ref, atol=1e-5, rtol=1e-5)
    print("KERNEL_OK")
</pallas_src>

<mosaic_0001>
module attributes {stable_mosaic.version = 11 : i64} {
  func.func @_pe_kernel(%arg0: i32, %arg1: i32, %arg2: memref<42xf32, #tpu.memory_space<smem>>, %arg3: memref<1x4x2x128xf32, #tpu.memory_space<vmem>>, %arg4: memref<1x6x2x128xf32, #tpu.memory_space<vmem>>) attributes {dimension_semantics = [#tpu.dimension_semantics<parallel>, #tpu.dimension_semantics<parallel>], iteration_bounds = array<i64: 2, 1>, scalar_prefetch = 0 : i64, scratch_operands = 0 : i64, tpu.core_type = #tpu.core_type<tc>, window_params = [{transform_indices = @transform_0, window_bounds = array<i64: 42>}, {transform_indices = @transform_1, window_bounds = array<i64: 1, 4, 2, 128>}, {transform_indices = @transform_2, window_bounds = array<i64: 1, 6, 2, 128>}]} {
    %c0 = arith.constant 0 : index
    %0 = memref.load %arg2[%c0] : memref<42xf32, #tpu.memory_space<smem>>
    %c1 = arith.constant 1 : index
    %1 = memref.load %arg2[%c1] : memref<42xf32, #tpu.memory_space<smem>>
    %c2 = arith.constant 2 : index
    %2 = memref.load %arg2[%c2] : memref<42xf32, #tpu.memory_space<smem>>
    %c3 = arith.constant 3 : index
    %3 = memref.load %arg2[%c3] : memref<42xf32, #tpu.memory_space<smem>>
    %c4 = arith.constant 4 : index
    %4 = memref.load %arg2[%c4] : memref<42xf32, #tpu.memory_space<smem>>
    %c5 = arith.constant 5 : index
    %5 = memref.load %arg2[%c5] : memref<42xf32, #tpu.memory_space<smem>>
    %c6 = arith.constant 6 : index
    %6 = memref.load %arg2[%c6] : memref<42xf32, #tpu.memory_space<smem>>
    %c7 = arith.constant 7 : index
    %7 = memref.load %arg2[%c7] : memref<42xf32, #tpu.memory_space<smem>>
    %c8 = arith.constant 8 : index
    %8 = memref.load %arg2[%c8] : memref<42xf32, #tpu.memory_space<smem>>
    %c9 = arith.constant 9 : index
    %9 = memref.load %arg2[%c9] : memref<42xf32, #tpu.memory_space<smem>>
    %c10 = arith.constant 10 : index
    %10 = memref.load %arg2[%c10] : memref<42xf32, #tpu.memory_space<smem>>
    %c11 = arith.constant 11 : index
    %11 = memref.load %arg2[%c11] : memref<42xf32, #tpu.memory_space<smem>>
    %c12 = arith.constant 12 : index
    %12 = memref.load %arg2[%c12] : memref<42xf32, #tpu.memory_space<smem>>
    %c13 = arith.constant 13 : index
    %13 = memref.load %arg2[%c13] : memref<42xf32, #tpu.memory_space<smem>>
    %c14 = arith.constant 14 : index
    %14 = memref.load %arg2[%c14] : memref<42xf32, #tpu.memory_space<smem>>
    %c15 = arith.constant 15 : index
    %15 = memref.load %arg2[%c15] : memref<42xf32, #tpu.memory_space<smem>>
    %c16 = arith.constant 16 : index
    %16 = memref.load %arg2[%c16] : memref<42xf32, #tpu.memory_space<smem>>
    %c17 = arith.constant 17 : index
    %17 = memref.load %arg2[%c17] : memref<42xf32, #tpu.memory_space<smem>>
    %c18 = arith.constant 18 : index
    %18 = memref.load %arg2[%c18] : memref<42xf32, #tpu.memory_space<smem>>
    %c19 = arith.constant 19 : index
    %19 = memref.load %arg2[%c19] : memref<42xf32, #tpu.memory_space<smem>>
    %c20 = arith.constant 20 : index
    %20 = memref.load %arg2[%c20] : memref<42xf32, #tpu.memory_space<smem>>
    %c21 = arith.constant 21 : index
    %21 = memref.load %arg2[%c21] : memref<42xf32, #tpu.memory_space<smem>>
    %c22 = arith.constant 22 : index
    %22 = memref.load %arg2[%c22] : memref<42xf32, #tpu.memory_space<smem>>
    %c23 = arith.constant 23 : index
    %23 = memref.load %arg2[%c23] : memref<42xf32, #tpu.memory_space<smem>>
    %c24 = arith.constant 24 : index
    %24 = memref.load %arg2[%c24] : memref<42xf32, #tpu.memory_space<smem>>
    %c25 = arith.constant 25 : index
    %25 = memref.load %arg2[%c25] : memref<42xf32, #tpu.memory_space<smem>>
    %c26 = arith.constant 26 : index
    %26 = memref.load %arg2[%c26] : memref<42xf32, #tpu.memory_space<smem>>
    %c27 = arith.constant 27 : index
    %27 = memref.load %arg2[%c27] : memref<42xf32, #tpu.memory_space<smem>>
    %c28 = arith.constant 28 : index
    %28 = memref.load %arg2[%c28] : memref<42xf32, #tpu.memory_space<smem>>
    %c29 = arith.constant 29 : index
    %29 = memref.load %arg2[%c29] : memref<42xf32, #tpu.memory_space<smem>>
    %c30 = arith.constant 30 : index
    %30 = memref.load %arg2[%c30] : memref<42xf32, #tpu.memory_space<smem>>
    %c31 = arith.constant 31 : index
    %31 = memref.load %arg2[%c31] : memref<42xf32, #tpu.memory_space<smem>>
    %c32 = arith.constant 32 : index
    %32 = memref.load %arg2[%c32] : memref<42xf32, #tpu.memory_space<smem>>
    %c33 = arith.constant 33 : index
    %33 = memref.load %arg2[%c33] : memref<42xf32, #tpu.memory_space<smem>>
    %c34 = arith.constant 34 : index
    %34 = memref.load %arg2[%c34] : memref<42xf32, #tpu.memory_space<smem>>
    %c35 = arith.constant 35 : index
    %35 = memref.load %arg2[%c35] : memref<42xf32, #tpu.memory_space<smem>>
    %c36 = arith.constant 36 : index
    %36 = memref.load %arg2[%c36] : memref<42xf32, #tpu.memory_space<smem>>
    %c37 = arith.constant 37 : index
    %37 = memref.load %arg2[%c37] : memref<42xf32, #tpu.memory_space<smem>>
    %c38 = arith.constant 38 : index
    %38 = memref.load %arg2[%c38] : memref<42xf32, #tpu.memory_space<smem>>
    %c39 = arith.constant 39 : index
    %39 = memref.load %arg2[%c39] : memref<42xf32, #tpu.memory_space<smem>>
    %c40 = arith.constant 40 : index
    %40 = memref.load %arg2[%c40] : memref<42xf32, #tpu.memory_space<smem>>
    %c41 = arith.constant 41 : index
    %41 = memref.load %arg2[%c41] : memref<42xf32, #tpu.memory_space<smem>>
    %c0_i32 = arith.constant 0 : i32
    %c1_i32 = arith.constant 1 : i32
    %42 = arith.muli %c0_i32, %c1_i32 : i32
    %c0_i32_0 = arith.constant 0 : i32
    %43 = arith.addi %c0_i32_0, %42 : i32
    %c2_i32 = arith.constant 2 : i32
    %44 = arith.muli %43, %c2_i32 : i32
    %45 = tpu.assume_multiple %44, 2 : i32
    %c0_1 = arith.constant 0 : index
    %c0_2 = arith.constant 0 : index
    %46 = arith.index_cast %45 : i32 to index
    %c0_3 = arith.constant 0 : index
    %47 = vector.load %arg3[%c0_1, %c0_2, %46, %c0_3] : memref<1x4x2x128xf32, #tpu.memory_space<vmem>>, vector<1x1x2x128xf32>
    %48 = vector.shape_cast %47 : vector<1x1x2x128xf32> to vector<2x128xf32>
    %c0_4 = arith.constant 0 : index
    %c1_5 = arith.constant 1 : index
    %49 = arith.index_cast %45 : i32 to index
    %c0_6 = arith.constant 0 : index
    %50 = vector.load %arg3[%c0_4, %c1_5, %49, %c0_6] : memref<1x4x2x128xf32, #tpu.memory_space<vmem>>, vector<1x1x2x128xf32>
    %51 = vector.shape_cast %50 : vector<1x1x2x128xf32> to vector<2x128xf32>
    %c0_7 = arith.constant 0 : index
    %c2_8 = arith.constant 2 : index
    %52 = arith.index_cast %45 : i32 to index
    %c0_9 = arith.constant 0 : index
    %53 = vector.load %arg3[%c0_7, %c2_8, %52, %c0_9] : memref<1x4x2x128xf32, #tpu.memory_space<vmem>>, vector<1x1x2x128xf32>
    %54 = vector.shape_cast %53 : vector<1x1x2x128xf32> to vector<2x128xf32>
    %c0_10 = arith.constant 0 : index
    %c3_11 = arith.constant 3 : index
    %55 = arith.index_cast %45 : i32 to index
    %c0_12 = arith.constant 0 : index
    %56 = vector.load %arg3[%c0_10, %c3_11, %55, %c0_12] : memref<1x4x2x128xf32, #tpu.memory_space<vmem>>, vector<1x1x2x128xf32>
    %57 = vector.shape_cast %56 : vector<1x1x2x128xf32> to vector<2x128xf32>
    %58 = vector.broadcast %0 : f32 to vector<2x128xf32>
    %59 = arith.mulf %48, %58 : vector<2x128xf32>
    %60 = vector.broadcast %6 : f32 to vector<2x128xf32>
    %61 = arith.mulf %51, %60 : vector<2x128xf32>
    %62 = arith.addf %59, %61 : vector<2x128xf32>
    %63 = vector.broadcast %12 : f32 to vector<2x128xf32>
    %64 = arith.mulf %54, %63 : vector<2x128xf32>
    %65 = arith.addf %62, %64 : vector<2x128xf32>
    %66 = vector.broadcast %18 : f32 to vector<2x128xf32>
    %67 = arith.mulf %57, %66 : vector<2x128xf32>
    %68 = arith.addf %65, %67 : vector<2x128xf32>
    %69 = vector.broadcast %24 : f32 to vector<2x128xf32>
    %70 = arith.addf %68, %69 : vector<2x128xf32>
    %71 = arith.mulf %70, %70 : vector<2x128xf32>
    %72 = vector.broadcast %1 : f32 to vector<2x128xf32>
    %73 = arith.mulf %48, %72 : vector<2x128xf32>
    %74 = vector.broadcast %7 : f32 to vector<2x128xf32>
    %75 = arith.mulf %51, %74 : vector<2x128xf32>
    %76 = arith.addf %73, %75 : vector<2x128xf32>
    %77 = vector.broadcast %13 : f32 to vector<2x128xf32>
    %78 = arith.mulf %54, %77 : vector<2x128xf32>
    %79 = arith.addf %76, %78 : vector<2x128xf32>
    %80 = vector.broadcast %19 : f32 to vector<2x128xf32>
    %81 = arith.mulf %57, %80 : vector<2x128xf32>
    %82 = arith.addf %79, %81 : vector<2x128xf32>
    %83 = vector.broadcast %25 : f32 to vector<2x128xf32>
    %84 = arith.addf %82, %83 : vector<2x128xf32>
    %85 = arith.addf %70, %84 : vector<2x128xf32>
    %86 = arith.mulf %84, %84 : vector<2x128xf32>
    %87 = arith.addf %71, %86 : vector<2x128xf32>
    %88 = vector.broadcast %2 : f32 to vector<2x128xf32>
    %89 = arith.mulf %48, %88 : vector<2x128xf32>
    %90 = vector.broadcast %8 : f32 to vector<2x128xf32>
    %91 = arith.mulf %51, %90 : vector<2x128xf32>
    %92 = arith.addf %89, %91 : vector<2x128xf32>
    %93 = vector.broadcast %14 : f32 to vector<2x128xf32>
    %94 = arith.mulf %54, %93 : vector<2x128xf32>
    %95 = arith.addf %92, %94 : vector<2x128xf32>
    %96 = vector.broadcast %20 : f32 to vector<2x128xf32>
    %97 = arith.mulf %57, %96 : vector<2x128xf32>
    %98 = arith.addf %95, %97 : vector<2x128xf32>
    %99 = vector.broadcast %26 : f32 to vector<2x128xf32>
    %100 = arith.addf %98, %99 : vector<2x128xf32>
    %101 = arith.addf %85, %100 : vector<2x128xf32>
    %102 = arith.mulf %100, %100 : vector<2x128xf32>
    %103 = arith.addf %87, %102 : vector<2x128xf32>
    %104 = vector.broadcast %3 : f32 to vector<2x128xf32>
    %105 = arith.mulf %48, %104 : vector<2x128xf32>
    %106 = vector.broadcast %9 : f32 to vector<2x128xf32>
    %107 = arith.mulf %51, %106 : vector<2x128xf32>
    %108 = arith.addf %105, %107 : vector<2x128xf32>
    %109 = vector.broadcast %15 : f32 to vector<2x128xf32>
    %110 = arith.mulf %54, %109 : vector<2x128xf32>
    %111 = arith.addf %108, %110 : vector<2x128xf32>
    %112 = vector.broadcast %21 : f32 to vector<2x128xf32>
    %113 = arith.mulf %57, %112 : vector<2x128xf32>
    %114 = arith.addf %111, %113 : vector<2x128xf32>
    %115 = vector.broadcast %27 : f32 to vector<2x128xf32>
    %116 = arith.addf %114, %115 : vector<2x128xf32>
    %117 = arith.addf %101, %116 : vector<2x128xf32>
    %118 = arith.mulf %116, %116 : vector<2x128xf32>
    %119 = arith.addf %103, %118 : vector<2x128xf32>
    %120 = vector.broadcast %4 : f32 to vector<2x128xf32>
    %121 = arith.mulf %48, %120 : vector<2x128xf32>
    %122 = vector.broadcast %10 : f32 to vector<2x128xf32>
    %123 = arith.mulf %51, %122 : vector<2x128xf32>
    %124 = arith.addf %121, %123 : vector<2x128xf32>
    %125 = vector.broadcast %16 : f32 to vector<2x128xf32>
    %126 = arith.mulf %54, %125 : vector<2x128xf32>
    %127 = arith.addf %124, %126 : vector<2x128xf32>
    %128 = vector.broadcast %22 : f32 to vector<2x128xf32>
    %129 = arith.mulf %57, %128 : vector<2x128xf32>
    %130 = arith.addf %127, %129 : vector<2x128xf32>
    %131 = vector.broadcast %28 : f32 to vector<2x128xf32>
    %132 = arith.addf %130, %131 : vector<2x128xf32>
    %133 = arith.addf %117, %132 : vector<2x128xf32>
    %134 = arith.mulf %132, %132 : vector<2x128xf32>
    %135 = arith.addf %119, %134 : vector<2x128xf32>
    %136 = vector.broadcast %5 : f32 to vector<2x128xf32>
    %137 = arith.mulf %48, %136 : vector<2x128xf32>
    %138 = vector.broadcast %11 : f32 to vector<2x128xf32>
    %139 = arith.mulf %51, %138 : vector<2x128xf32>
    %140 = arith.addf %137, %139 : vector<2x128xf32>
    %141 = vector.broadcast %17 : f32 to vector<2x128xf32>
    %142 = arith.mulf %54, %141 : vector<2x128xf32>
    %143 = arith.addf %140, %142 : vector<2x128xf32>
    %144 = vector.broadcast %23 : f32 to vector<2x128xf32>
    %145 = arith.mulf %57, %144 : vector<2x128xf32>
    %146 = arith.addf %143, %145 : vector<2x128xf32>
    %147 = vector.broadcast %29 : f32 to vector<2x128xf32>
    %148 = arith.addf %146, %147 : vector<2x128xf32>
    %149 = arith.addf %133, %148 : vector<2x128xf32>
    %150 = arith.mulf %148, %148 : vector<2x128xf32>
    %151 = arith.addf %135, %150 : vector<2x128xf32>
    %cst = arith.constant 0.166666672 : f32
    %152 = vector.broadcast %cst : f32 to vector<2x128xf32>
    %153 = arith.mulf %149, %152 : vector<2x128xf32>
    %cst_13 = arith.constant 0.166666672 : f32
    %154 = vector.broadcast %cst_13 : f32 to vector<2x128xf32>
    %155 = arith.mulf %151, %154 : vector<2x128xf32>
    %156 = arith.mulf %153, %153 : vector<2x128xf32>
    %157 = arith.subf %155, %156 : vector<2x128xf32>
    %cst_14 = arith.constant 0.000000e+00 : f32
    %158 = vector.broadcast %cst_14 : f32 to vector<2x128xf32>
    %159 = arith.maximumf %157, %158 : vector<2x128xf32>
    %cst_15 = arith.constant 9.99999974E-6 : f32
    %160 = vector.broadcast %cst_15 : f32 to vector<2x128xf32>
    %161 = arith.addf %159, %160 : vector<2x128xf32>
    %162 = math.rsqrt %161 : vector<2x128xf32>
    %163 = arith.subf %70, %153 : vector<2x128xf32>
    %164 = arith.mulf %163, %162 : vector<2x128xf32>
    %165 = vector.broadcast %30 : f32 to vector<2x128xf32>
    %166 = arith.mulf %164, %165 : vector<2x128xf32>
    %167 = vector.broadcast %36 : f32 to vector<2x128xf32>
    %168 = arith.addf %166, %167 : vector<2x128xf32>
    %c0_16 = arith.constant 0 : index
    %c0_17 = arith.constant 0 : index
    %169 = arith.index_cast %45 : i32 to index
    %c0_18 = arith.constant 0 : index
    %170 = vector.load %arg4[%c0_16, %c0_17, %169, %c0_18] : memref<1x6x2x128xf32, #tpu.memory_space<vmem>>, vector<1x1x2x128xf32>
    %171 = vector.shape_cast %170 : vector<1x1x2x128xf32> to vector<2x128xf32>
    %172 = vector.shape_cast %168 : vector<2x128xf32> to vector<1x1x2x128xf32>
    tpu.vector_store %arg4[%c0_16, %c0_17, %169, %c0_18], %172 {strides = array<i32>} : memref<1x6x2x128xf32, #tpu.memory_space<vmem>>, vector<1x1x2x128xf32>,
    %173 = arith.subf %84, %153 : vector<2x128xf32>
    %174 = arith.mulf %173, %162 : vector<2x128xf32>
    %175 = vector.broadcast %31 : f32 to vector<2x128xf32>
    %176 = arith.mulf %174, %175 : vector<2x128xf32>
    %177 = vector.broadcast %37 : f32 to vector<2x128xf32>
    %178 = arith.addf %176, %177 : vector<2x128xf32>
    %c0_19 = arith.constant 0 : index
    %c1_20 = arith.constant 1 : index
    %179 = arith.index_cast %45 : i32 to index
    %c0_21 = arith.constant 0 : index
    %180 = vector.load %arg4[%c0_19, %c1_20, %179, %c0_21] : memref<1x6x2x128xf32, #tpu.memory_space<vmem>>, vector<1x1x2x128xf32>
    %181 = vector.shape_cast %180 : vector<1x1x2x128xf32> to vector<2x128xf32>
    %182 = vector.shape_cast %178 : vector<2x128xf32> to vector<1x1x2x128xf32>
    tpu.vector_store %arg4[%c0_19, %c1_20, %179, %c0_21], %182 {strides = array<i32>} : memref<1x6x2x128xf32, #tpu.memory_space<vmem>>, vector<1x1x2x128xf32>,
    %183 = arith.subf %100, %153 : vector<2x128xf32>
    %184 = arith.mulf %183, %162 : vector<2x128xf32>
    %185 = vector.broadcast %32 : f32 to vector<2x128xf32>
    %186 = arith.mulf %184, %185 : vector<2x128xf32>
    %187 = vector.broadcast %38 : f32 to vector<2x128xf32>
    %188 = arith.addf %186, %187 : vector<2x128xf32>
    %c0_22 = arith.constant 0 : index
    %c2_23 = arith.constant 2 : index
    %189 = arith.index_cast %45 : i32 to index
    %c0_24 = arith.constant 0 : index
    %190 = vector.load %arg4[%c0_22, %c2_23, %189, %c0_24] : memref<1x6x2x128xf32, #tpu.memory_space<vmem>>, vector<1x1x2x128xf32>
    %191 = vector.shape_cast %190 : vector<1x1x2x128xf32> to vector<2x128xf32>
    %192 = vector.shape_cast %188 : vector<2x128xf32> to vector<1x1x2x128xf32>
    tpu.vector_store %arg4[%c0_22, %c2_23, %189, %c0_24], %192 {strides = array<i32>} : memref<1x6x2x128xf32, #tpu.memory_space<vmem>>, vector<1x1x2x128xf32>,
    %193 = arith.subf %116, %153 : vector<2x128xf32>
    %194 = arith.mulf %193, %162 : vector<2x128xf32>
    %195 = vector.broadcast %33 : f32 to vector<2x128xf32>
    %196 = arith.mulf %194, %195 : vector<2x128xf32>
    %197 = vector.broadcast %39 : f32 to vector<2x128xf32>
    %198 = arith.addf %196, %197 : vector<2x128xf32>
    %c0_25 = arith.constant 0 : index
    %c3_26 = arith.constant 3 : index
    %199 = arith.index_cast %45 : i32 to index
    %c0_27 = arith.constant 0 : index
    %200 = vector.load %arg4[%c0_25, %c3_26, %199, %c0_27] : memref<1x6x2x128xf32, #tpu.memory_space<vmem>>, vector<1x1x2x128xf32>
    %201 = vector.shape_cast %200 : vector<1x1x2x128xf32> to vector<2x128xf32>
    %202 = vector.shape_cast %198 : vector<2x128xf32> to vector<1x1x2x128xf32>
    tpu.vector_store %arg4[%c0_25, %c3_26, %199, %c0_27], %202 {strides = array<i32>} : memref<1x6x2x128xf32, #tpu.memory_space<vmem>>, vector<1x1x2x128xf32>,
    %203 = arith.subf %132, %153 : vector<2x128xf32>
    %204 = arith.mulf %203, %162 : vector<2x128xf32>
    %205 = vector.broadcast %34 : f32 to vector<2x128xf32>
    %206 = arith.mulf %204, %205 : vector<2x128xf32>
    %207 = vector.broadcast %40 : f32 to vector<2x128xf32>
    %208 = arith.addf %206, %207 : vector<2x128xf32>
    %c0_28 = arith.constant 0 : index
    %c4_29 = arith.constant 4 : index
    %209 = arith.index_cast %45 : i32 to index
    %c0_30 = arith.constant 0 : index
    %210 = vector.load %arg4[%c0_28, %c4_29, %209, %c0_30] : memref<1x6x2x128xf32, #tpu.memory_space<vmem>>, vector<1x1x2x128xf32>
    %211 = vector.shape_cast %210 : vector<1x1x2x128xf32> to vector<2x128xf32>
    %212 = vector.shape_cast %208 : vector<2x128xf32> to vector<1x1x2x128xf32>
    tpu.vector_store %arg4[%c0_28, %c4_29, %209, %c0_30], %212 {strides = array<i32>} : memref<1x6x2x128xf32, #tpu.memory_space<vmem>>, vector<1x1x2x128xf32>,
    %213 = arith.subf %148, %153 : vector<2x128xf32>
    %214 = arith.mulf %213, %162 : vector<2x128xf32>
    %215 = vector.broadcast %35 : f32 to vector<2x128xf32>
    %216 = arith.mulf %214, %215 : vector<2x128xf32>
    %217 = vector.broadcast %41 : f32 to vector<2x128xf32>
    %218 = arith.addf %216, %217 : vector<2x128xf32>
    %c0_31 = arith.constant 0 : index
    %c5_32 = arith.constant 5 : index
    %219 = arith.index_cast %45 : i32 to index
    %c0_33 = arith.constant 0 : index
    %220 = vector.load %arg4[%c0_31, %c5_32, %219, %c0_33] : memref<1x6x2x128xf32, #tpu.memory_space<vmem>>, vector<1x1x2x128xf32>
    %221 = vector.shape_cast %220 : vector<1x1x2x128xf32> to vector<2x128xf32>
    %222 = vector.shape_cast %218 : vector<2x128xf32> to vector<1x1x2x128xf32>
    tpu.vector_store %arg4[%c0_31, %c5_32, %219, %c0_33], %222 {strides = array<i32>} : memref<1x6x2x128xf32, #tpu.memory_space<vmem>>, vector<1x1x2x128xf32>,
    %c1_i32_34 = arith.constant 1 : i32
    return
  }
  func.func @transform_0(%arg0: i32, %arg1: i32) -> i32 {
    %c0_i32 = arith.constant 0 : i32
    %c0_i32_0 = arith.constant 0 : i32
    return %c0_i32 : i32
  }
  func.func @transform_1(%arg0: i32, %arg1: i32) -> (i32, i32, i32, i32) {
    %c0_i32 = arith.constant 0 : i32
    %c0_i32_0 = arith.constant 0 : i32
    %c0_i32_1 = arith.constant 0 : i32
    return %arg0, %c0_i32, %arg1, %c0_i32_0 : i32, i32, i32, i32
  }
  func.func @transform_2(%arg0: i32, %arg1: i32) -> (i32, i32, i32, i32) {
    %c0_i32 = arith.constant 0 : i32
    %c0_i32_0 = arith.constant 0 : i32
    %c0_i32_1 = arith.constant 0 : i32
    return %arg0, %c0_i32, %arg1, %c0_i32_0 : i32, i32, i32, i32
  }
}

</mosaic_0001>

<bundles_post_ra>
// kernel: tpu_custom_call.1
= control target key start
LH: loop header
LB: loop body
LE: loop exit
PB: predicated region body
PF: predicated region fallthrough
CT: control target
= control target key end

     0   :  { %7 = vsyncpa [#allocation5], 0  ;;  %s1118_s0 = inlined_call_operand.hbm [shape: f32[42], index: 0, kind: input, shape index: {}]   ;;  %s1119_s1 = inlined_call_operand.hbm [shape: f32[2,4,2,128], index: 1, kind: input, shape index: {}]   ;;  %s1120_s2 = inlined_call_operand.hbm [shape: f32[2,6,2,128], index: 2, kind: output, shape index: {}]  }
   0x1   :  { %8 = vsyncpa [#allocation3], 0 }
   0x2   :  { %10 = vsyncpa [#allocation3 + $0x1], 0 }
   0x3   :  { %11 = vsyncpa [#allocation4], 0 }
   0x4   :  { %13 = vsyncpa [#allocation4 + $0x1], 0  ;;  %s826_s9 = smov 0   ;;  %s828_s10 = smov 0  }
   0x5   :  { %s830_s11 = smov 0   ;;  %s832_s12 = smov 0  }
   0x6   :  { %s834_s13 = smov 0   ;;  %s836_s14 = smov 0  }
   0x7 LB: > { %s528_s15 = sadd.s32 4294967295, %s804_s14   ;;  %s529_s16 = sadd.s32 4294967294, %s804_s14   ;;  %s804_s14 = sphi %s836_s14, %s19_s14   ;;  %s800_s13 = sphi %s834_s13, %s1132_s13   ;;  %s796_s12 = sphi %s832_s12, %s1131_s12   ;;  %s792_s11 = sphi %s830_s11, %s1130_s11   ;;  %s788_s10 = sphi %s828_s10, %s1129_s10   ;;  %s784_s9 = sphi %s826_s9, %s1128_s9  }
   0x8   : > { %s61_s17 = sadd.s32 1, %s792_s11  ;;  %p68_p0 = scmp.ne.s32.totalorder %s792_s11, %s788_s10 }
   0x9   : > { %p69_p1 = scmp.eq.s32.totalorder %s804_s14, 0  ;;  %p74_p2 = scmp.ne.s32.totalorder %s788_s10, %s784_s9 }
   0xa   : > { %p864_p3 = scmp.eq.s32.totalorder %s528_s15, 0  ;;  %p100_p4 = scmp.eq.s32.totalorder %s528_s15, 1 }
   0xb   : > { %p868_p5 = por %p69_p1, %p68_p0  ;;  %p106_p6 = scmp.eq.s32.totalorder %s529_s16, 1 }
   0xc   : > { %p874_p7 = por %p864_p3, %p74_p2  ;;  %p878_p8 = por %p100_p4, %p68_p0 }
   0xd   : > { %p882_p9 = por %p106_p6, %p74_p2  ;;  %p530_p10 = scmp.ge.s32.totalorder %s804_s14, 1 }
   0xe   : > { %p113_p11 = scmp.lt.s32.totalorder %s804_s14, 3  ;;  %s125_s25 = sshll.u32 %s1118_s0, 4  ;;  %s126_s25 = int_to_ptr.hbm [resolvable:$true] %s125_s25 }
   0xf   : > { %p532_p13 = scmp.ge.s32.totalorder %s804_s14, 2  ;;  %p615_p0 = scmp.lt.s32.totalorder %s804_s14, 2 }
  0x10   : > { %p891_p12 = pnand %p530_p10, %p113_p11  ;;  %s31_s28 = sadd.s32 1, %s800_s13 }
  0x11   : > { %p901_p2 = pnand %p615_p0, %p868_p5  ;;  %p33_p6 = scmp.ge.s32.totalorder %s31_s28, 2 }
  0x12   : > { %p602_p1 = pneg %p891_p12  ;;  %s136_s29 = sand.u32 1, %s792_s11  }
  0x13   : > { %s806_s30 = smov [#allocation2]   ;;  %s1134_s28 = smov (%p33_p6, %s31_s28), 0 }
  0x14   : > { %p603_p4 = pnand %p602_p1, %p864_p3  ;;  %s533_s3 = sshll.u32 %s136_s29, 3 }
  0x15   : > { %s56_s4 = ssub.s32 %s800_s13, %s1134_s28  ;;  %s591_s5 = sshll.u32 %s800_s13, 3 }
  0x16   : > { %605 = dma.hbm_to_smem (!%p603_p4), %s126_s25, 16, %s806_s30, [#allocation5]  }
  0x17   : > { %p59_p10 = scmp.eq.s32.totalorder %s56_s4, 0  ;;  %s146_s8 = scalar_lea.hbm %s1119_s1, %s591_s5 }
  0x18   : > { %s140_s15 = scalar_lea.vmem [#allocation6], %s533_s3  ;;  %s147_s23 = sshll.u32 %s146_s8, 4  ;;  %s148_s23 = int_to_ptr.hbm [resolvable:$true] %s147_s23 }
  0x19   : > { %s149_s16 = sshll.u32 %s140_s15, 4  ;;  %s137_s24 = scalar_lea.sflag [#allocation3], %s136_s29  ;;  %s150_s16 = int_to_ptr.vmem [resolvable:$true] %s149_s16 }
  0x1a   : > { %s920_s19 = scalar_select %p59_p10, %s792_s11, %s61_s17  }
  0x1b   : > { %s807_s25 = smov 32   ;;  %s808_s30 = smov 2  }
  0x1c   : > { %609 = dma.hbm_to_vmem [thread:$0]  (!%p901_p2), %s148_s23, 128, %s150_s16, %s137_s24, %s807_s25, %s807_s25, %s808_s30  }
  0x1d   : > { %161 = sbr.rel (%p891_p12) target bundleno = 128 (0x80), region = 28 }
  0x22   : > { %771 = dma.done.wait (%p864_p3), [#allocation5], 16  }
  0x23   : > { %773 = vsyncadd (%p864_p3), [#allocation5], 4294967280  ;;  %s931_s17 = sand.u32 1, %s788_s10  }
  0x24   : > { %s538_s29 = sshll.u32 %s931_s17, 3  ;;  %s169_s3 = scalar_lea.sflag [#allocation3], %s931_s17 }
  0x25   : > { %s935_s4 = scalar_lea.vmem [#allocation6], %s538_s29 }
  0x26   : > { %775 = dma.done.wait (%p874_p7), %s169_s3, 128  }
  0x27   : > { %777 = vsyncadd (%p874_p7), %s169_s3, 4294967168 }
  0x28   : > { %178 = sfence }
  0x29   : > { %s195_s26 = sld [smem:[#allocation2]]  ;;  %v237_v0 = vld [vmem:[%s935_s4] sm:$0x3]  ;;  %v580_v2 = vld [vmem:[%s935_s4 + $0x2] sm:$0x3] }
  0x2a   : > { %s941_s18 = sld [smem:[#allocation2 + $0x1]]  ;;  %v581_v14 = vld [vmem:[%s935_s4 + $0x4] sm:$0x3]  ;;  %v582_v37 = vld [vmem:[%s935_s4 + $0x6] sm:$0x3] }
  0x2b   : > { %s943_s27 = sld [smem:[#allocation2 + $0x2]] }
  0x2c   : > { %s945_s5 = sld [smem:[#allocation2 + $0x3]] }
  0x2d   : > { %s947_s6 = sld [smem:[#allocation2 + $0x4]] }
  0x2e   : > { %s949_s7 = sld [smem:[#allocation2 + $0x5]] }
  0x2f   : > { %s544_s8 = sld [smem:[#allocation2 + $0x6]]  ;;  %v247_v1 = vstv %s195_s26 }
  0x30   : > { %s545_s15 = sld [smem:[#allocation2 + $0x7]]  ;;  %v261_v4 = vstv %s941_s18  ;;  %v248_v6 = vmul.f32 %v247_v1, %v237_v0 }
  0x31   : > { %s546_s20 = sld [smem:[#allocation2 + $0x8]]  ;;  %v277_v7 = vstv %s943_s27  ;;  %v262_v15 = vmul.f32 %v261_v4, %v237_v0 }
  0x32   : > { %s951_s16 = sld [smem:[#allocation2 + $0x9]]  ;;  %v293_v9 = vstv %s945_s5  ;;  %v278_v18 = vmul.f32 %v277_v7, %v237_v0 }
  0x33   : > { %s953_s23 = sld [smem:[#allocation2 + $0xa]]  ;;  %v309_v12 = vstv %s947_s6  ;;  %v294_v20 = vmul.f32 %v293_v9, %v237_v0 }
  0x34   : > { %s955_s24 = sld [smem:[#allocation2 + $0xb]]  ;;  %v325_v13 = vstv %s949_s7  ;;  %v310_v24 = vmul.f32 %v309_v12, %v237_v0 }
  0x35   : > { %s958_s25 = sld [smem:[#allocation2 + $0xc]]  ;;  %v249_v3 = vstv %s544_s8  ;;  %v326_v25 = vmul.f32 %v325_v13, %v237_v0 }
  0x36   : > { %s961_s30 = sld [smem:[#allocation2 + $0xd]]  ;;  %v263_v5 = vstv %s545_s15  ;;  %v250_v10 = vmul.f32 %v580_v2, %v249_v3 }
  0x37   : > { %s964_s29 = sld [smem:[#allocation2 + $0xe]]  ;;  %v279_v8 = vstv %s546_s20  ;;  %v264_v16 = vmul.f32 %v580_v2, %v263_v5 }
  0x38   : > { %s968_s3 = sld [smem:[#allocation2 + $0xf]]  ;;  %v295_v11 = vstv %s951_s16  ;;  %v280_v19 = vmul.f32 %v580_v2, %v279_v8  ;;  %v251_v26 = vadd.f32 %v250_v10, %v248_v6 }
  0x39   : > { %s973_s26 = sld [smem:[#allocation2 + $0x10]]  ;;  %v311_v17 = vstv %s953_s23  ;;  %v296_v23 = vmul.f32 %v580_v2, %v295_v11  ;;  %v265_v30 = vadd.f32 %v264_v16, %v262_v15 }
  0x3a   : > { %s977_s18 = sld [smem:[#allocation2 + $0x11]]  ;;  %v327_v21 = vstv %s955_s24  ;;  %v312_v29 = vmul.f32 %v580_v2, %v311_v17  ;;  %v281_v34 = vadd.f32 %v280_v19, %v278_v18 }
  0x3b   : > { %s980_s27 = sld [smem:[#allocation2 + $0x12]]  ;;  %v252_v22 = vstv %s958_s25  ;;  %v328_v33 = vmul.f32 %v580_v2, %v327_v21  ;;  %v297_v38 = vadd.f32 %v296_v23, %v294_v20 }
  0x3c   : > { %s983_s5 = sld [smem:[#allocation2 + $0x13]]  ;;  %v253_v27 = vmul.f32 %v581_v14, %v252_v22  ;;  %v266_v28 = vstv %s961_s30  ;;  %v313_v42 = vadd.f32 %v312_v29, %v310_v24 }
  0x3d   : > { %s986_s6 = sld [smem:[#allocation2 + $0x14]]  ;;  %v267_v31 = vmul.f32 %v581_v14, %v266_v28  ;;  %v282_v32 = vstv %s964_s29  ;;  %v329_v47 = vadd.f32 %v328_v33, %v326_v25 }
  0x3e   : > { %s989_s7 = sld [smem:[#allocation2 + $0x15]]  ;;  %v283_v35 = vmul.f32 %v581_v14, %v282_v32  ;;  %v298_v36 = vstv %s968_s3  ;;  %v254_v41 = vadd.f32 %v253_v27, %v251_v26 }
  0x3f   : > { %s992_s8 = sld [smem:[#allocation2 + $0x16]]  ;;  %v299_v39 = vmul.f32 %v581_v14, %v298_v36  ;;  %v314_v40 = vstv %s973_s26  ;;  %v268_v46 = vadd.f32 %v267_v31, %v265_v30 }
  0x40   : > { %s996_s15 = sld [smem:[#allocation2 + $0x17]]  ;;  %v315_v43 = vmul.f32 %v581_v14, %v314_v40  ;;  %v330_v44 = vstv %s977_s18  ;;  %v284_v51 = vadd.f32 %v283_v35, %v281_v34 }
  0x41   : > { %s562_s20 = sld [smem:[#allocation2 + $0x18]]  ;;  %v255_v45 = vstv %s980_s27  ;;  %v331_v48 = vmul.f32 %v581_v14, %v330_v44  ;;  %v300_v54 = vadd.f32 %v299_v39, %v297_v38 }
  0x42   : > { %s563_s16 = sld [smem:[#allocation2 + $0x19]]  ;;  %v256_v49 = vmul.f32 %v582_v37, %v255_v45  ;;  %v269_v50 = vstv %s983_s5  ;;  %v316_v58 = vadd.f32 %v315_v43, %v313_v42 }
  0x43   : > { %s564_s4 = sld [smem:[#allocation2 + $0x1a]]  ;;  %v270_v52 = vmul.f32 %v582_v37, %v269_v50  ;;  %v285_v53 = vstv %s986_s6  ;;  %v332_v62 = vadd.f32 %v331_v48, %v329_v47 }
  0x44   : > { %s565_s23 = sld [smem:[#allocation2 + $0x1b]]  ;;  %v257_v55 = vadd.f32 %v256_v49, %v254_v41  ;;  %v286_v56 = vmul.f32 %v582_v37, %v285_v53  ;;  %v301_v57 = vstv %s989_s7 }
  0x45   : > { %s566_s24 = sld [smem:[#allocation2 + $0x1c]]  ;;  %v271_v59 = vadd.f32 %v270_v52, %v268_v46  ;;  %v302_v60 = vmul.f32 %v582_v37, %v301_v57  ;;  %v317_v61 = vstv %s992_s8 }
  0x46   : > { %s567_s25 = sld [smem:[#allocation2 + $0x1d]]  ;;  %v287_v63 = vadd.f32 %v286_v56, %v284_v51  ;;  %v318_v0 = vmul.f32 %v582_v37, %v317_v61  ;;  %v333_v1 = vstv %s996_s15 }
  0x47   : > { %v258_v2 = vstv %s562_s20  ;;  %v303_v3 = vadd.f32 %v302_v60, %v300_v54  ;;  %v334_v4 = vmul.f32 %v582_v37, %v333_v1  ;;  %s1035_s30 = sld [smem:[#allocation2 + $0x1e]] }
  0x48   : > { %v1005_v5 = vadd.f32 %v258_v2, %v257_v55  ;;  %v272_v6 = vstv %s563_s16  ;;  %v319_v7 = vadd.f32 %v318_v0, %v316_v58  ;;  %s1037_s29 = sld [smem:[#allocation2 + $0x24]]  ;;  %s592_s16 = smul.u32 12, %s931_s17 }
  0x49   : > { %v1007_v8 = vadd.f32 %v272_v6, %v271_v59  ;;  %v288_v9 = vstv %s564_s4  ;;  %v335_v10 = vadd.f32 %v334_v4, %v332_v62  ;;  %s1039_s3 = sld [smem:[#allocation2 + $0x1f]]  ;;  %s593_s4 = smul.u32 12, %s796_s12 }
  0x4a   : > { %v260_v11 = vmul.f32 %v1005_v5, %v1005_v5  ;;  %v1011_v12 = vadd.f32 %v288_v9, %v287_v63  ;;  %v304_v13 = vstv %s565_s23  ;;  %s1041_s26 = sld [smem:[#allocation2 + $0x25]] }
  0x4b   : > { %v274_v14 = vadd.f32 %v1007_v8, %v1005_v5  ;;  %v275_v15 = vmul.f32 %v1007_v8, %v1007_v8  ;;  %v1017_v16 = vadd.f32 %v304_v13, %v303_v3  ;;  %v320_v17 = vstv %s566_s24  ;;  %s1043_s18 = sld [smem:[#allocation2 + $0x20]]  ;;  %s419_s12 = scalar_lea.hbm %s1120_s2, %s593_s4 }
  0x4c   : > { %v291_v18 = vmul.f32 %v1011_v12, %v1011_v12  ;;  %v1021_v19 = vadd.f32 %v320_v17, %v319_v7  ;;  %v336_v20 = vstv %s567_s25  ;;  %s1045_s27 = sld [smem:[#allocation2 + $0x21]]  ;;  %s194_s25 = scalar_lea.vmem [#allocation7], %s592_s16 }
  0x4d   : > { %v276_v21 = vadd.f32 %v275_v15, %v260_v11  ;;  %v290_v22 = vadd.f32 %v1011_v12, %v274_v14  ;;  %v307_v23 = vmul.f32 %v1017_v16, %v1017_v16  ;;  %v1026_v24 = vadd.f32 %v336_v20, %v335_v10  ;;  %s1047_s5 = sld [smem:[#allocation2 + $0x22]] }
  0x4e   : > { %v323_v27 = vmul.f32 %v1021_v19, %v1021_v19  ;;  %s1049_s6 = sld [smem:[#allocation2 + $0x23]]  ;;  %v359_v50 = vstv %s1035_s30  ;;  %v361_v53 = vstv %s1037_s29  ;;  %s420_s30 = sshll.u32 %s194_s25, 4  ;;  %s421_s30 = int_to_ptr.vmem [resolvable:$true] %s420_s30 }
  0x4f   : > { %v292_v25 = vadd.f32 %v291_v18, %v276_v21  ;;  %v306_v26 = vadd.f32 %v1017_v16, %v290_v22  ;;  %v339_v30 = vmul.f32 %v1026_v24, %v1026_v24  ;;  %s1051_s7 = sld [smem:[#allocation2 + $0x26]]  ;;  %v366_v54 = vstv %s1039_s3  ;;  %s422_s29 = sshll.u32 %s419_s12, 4  ;;  %s423_s29 = int_to_ptr.hbm [resolvable:$true] %s422_s29 }
  0x50   : > { %s1053_s8 = sld [smem:[#allocation2 + $0x27]]  ;;  %v368_v55 = vstv %s1041_s26  ;;  %s407_s3 = scalar_lea.sflag [#allocation4], %s931_s17 }
  0x51   : > { %v308_v28 = vadd.f32 %v307_v23, %v292_v25  ;;  %v322_v29 = vadd.f32 %v1021_v19, %v306_v26  ;;  %s1055_s15 = sld [smem:[#allocation2 + $0x28]]  ;;  %v374_v56 = vstv %s1043_s18  ;;  %s732_s26 = sshra.s32 %s423_s29, 4  ;;  %s733_s26 = int_to_ptr.hbm [resolvable:$true] %s732_s26 }
  0x52   : > { %s1061_s20 = sld [smem:[#allocation2 + $0x29]]  ;;  %v382_v58 = vstv %s1045_s27  ;;  %s734_s18 = scalar_lea.hbm %s733_s26, 12 }
  0x53   : > { %v324_v31 = vadd.f32 %v323_v27, %v308_v28  ;;  %v338_v32 = vadd.f32 %v1026_v24, %v322_v29  ;;  %v390_v59 = vstv %s1047_s5  ;;  %p735_p3 = scmp.ne.s32.totalorder %s733_s26, %s734_s18  ;;  %p739_p11 = scmp.lt.s32.totalorder %s733_s26, %s1120_s2 }
  0x54   : > { %v399_v60 = vstv %s1049_s6  ;;  %s738_s6 = scalar_lea.hbm %s1120_s2, 24 }
  0x55   : > { %v340_v33 = vadd.f32 %v339_v30, %v324_v31  ;;  %v341_v34 = vmul.f32 0.16666667, %v338_v32  ;;  %v376_v1 = vstv %s1051_s7  ;;  %p736_p5 = pnand %p735_p3, %p878_p8  ;;  %p740_p12 = scmp.lt.s32.totalorder %s738_s6, %s734_s18 }
  0x56   : > { %v384_v2 = vstv %s1053_s8 }
  0x57   : > { %v342_v35 = vmul.f32 0.16666667, %v340_v33  ;;  %v343_v36 = vmul.f32 %v341_v34, %v341_v34  ;;  %v357_v45 = vsub.f32 %v1005_v5, %v341_v34  ;;  %v364_v46 = vsub.f32 %v1007_v8, %v341_v34  ;;  %p737_p7 = pneg %p736_p5  ;;  %p741_p0 = por %p740_p12, %p739_p11 }
  0x58   : > { %v372_v47 = vsub.f32 %v1011_v12, %v341_v34  ;;  %v380_v48 = vsub.f32 %v1017_v16, %v341_v34  ;;  %v388_v51 = vsub.f32 %v1021_v19, %v341_v34  ;;  %v397_v52 = vsub.f32 %v1026_v24, %v341_v34 }
  0x59   : > { %v344_v37 = vsub.f32 %v342_v35, %v343_v36  ;;  %v392_v10 = vstv %s1055_s15  ;;  %v401_v15 = vstv %s1061_s20  ;;  %p742_p1 = pnand %p741_p0, %p737_p7 }
  0x5b   : > { %v345_v38 = vmax.f32 %v344_v37, 0.0 }
  0x5d   : > { %v346_v39 = vadd.f32 1e-05, %v345_v38 }
  0x5f   : > { %671 = vrsqrt.f32 %v346_v39  ;;  %vm353_vm0 = vweird.f32 %v346_v39 }
  0x65   : > { %v672_v40 = vpop.eup %671 }
  0x66   : > { %v348_v41 = vmul.f32 %v672_v40, %v346_v39  ;;  %vm354_vm1 = vweird.f32 %v672_v40 }
  0x67   : > { %vm355_vm2 = vmor %vm353_vm0, %vm354_vm1 }
  0x68   : > { %v349_v42 = vmul.f32 %v672_v40, %v348_v41 }
  0x6a   : > { %v350_v43 = vmul.f32 0.5, %v349_v42 }
  0x6c   : > { %v351_v44 = vsub.f32 1.5, %v350_v43 }
  0x6e   : > { %v352_v49 = vmul.f32 %v672_v40, %v351_v44 }
  0x70   : > { %v356_v57 = vsel %vm355_vm2, %v672_v40, %v352_v49 }
  0x71   : > { %v358_v61 = vmul.f32 %v357_v45, %v356_v57  ;;  %v365_v62 = vmul.f32 %v364_v46, %v356_v57  ;;  %v373_v63 = vmul.f32 %v372_v47, %v356_v57  ;;  %v381_v0 = vmul.f32 %v380_v48, %v356_v57 }
  0x72   : > { %v389_v3 = vmul.f32 %v388_v51, %v356_v57  ;;  %v398_v4 = vmul.f32 %v397_v52, %v356_v57 }
  0x73   : > { %v360_v5 = vmul.f32 %v359_v50, %v358_v61  ;;  %v367_v6 = vmul.f32 %v366_v54, %v365_v62  ;;  %v375_v7 = vmul.f32 %v374_v56, %v373_v63  ;;  %v383_v8 = vmul.f32 %v382_v58, %v381_v0 }
  0x74   : > { %v391_v9 = vmul.f32 %v390_v59, %v389_v3  ;;  %v400_v11 = vmul.f32 %v399_v60, %v398_v4 }
  0x75   : > { %v362_v12 = vadd.f32 %v361_v53, %v360_v5  ;;  %v369_v13 = vadd.f32 %v368_v55, %v367_v6  ;;  %v377_v14 = vadd.f32 %v376_v1, %v375_v7  ;;  %v385_v16 = vadd.f32 %v384_v2, %v383_v8 }
  0x76   : > { %v393_v17 = vadd.f32 %v392_v10, %v391_v9  ;;  %v402_v18 = vadd.f32 %v401_v15, %v400_v11 }
  0x77   : > { %363 = vst [vmem:[%s194_s25] sm:$0x3] %v362_v12 }
  0x78   : > { %583 = vst [vmem:[%s194_s25 + $0x2] sm:$0x3] %v369_v13 }
  0x79   : > { %584 = vst [vmem:[%s194_s25 + $0x4] sm:$0x3] %v377_v14 }
  0x7a   : > { %585 = vst [vmem:[%s194_s25 + $0x6] sm:$0x3] %v385_v16 }
  0x7b   : > { %586 = vst [vmem:[%s194_s25 + $0x8] sm:$0x3] %v393_v17 }
  0x7c   : > { %587 = vst [vmem:[%s194_s25 + $0xa] sm:$0x3] %v402_v18 }
  0x7d   : > { %745 = shalt.err (!%p742_p1)
}
  0x7e   : > { %s809_s17 = smov 32   ;;  %s810_s15 = smov 2  }
  0x7f   : > { %600 = dma.vmem_to_hbm [thread:$0]  (%p878_p8), %s421_s30, 192, %s423_s29, %s407_s3, %s809_s17, %s809_s17, %s810_s15  }
  0x80 PF: > { %s437_s20 = sand.u32 1, %s784_s9   ;;  %p611_p2 = pnand %p532_p13, %p882_p9 }
  0x81   : > { %s438_s16 = scalar_lea.sflag [#allocation4], %s437_s20 }
  0x82   : > { %p612_p4 = pneg %p611_p2 }
  0x84   : > { %779 = dma.done.wait (%p612_p4), %s438_s16, 192  }
  0x85   : > { %781 = vsyncadd (%p612_p4), %s438_s16, 4294967104  ;;  %s19_s14 = sadd.s32 1, %s804_s14   ;;  %s1128_s9 = smov %s788_s10 }
  0x86   : > { %p16_p6 = scmp.ge.s32.totalorder %s19_s14, 4   ;;  %s1129_s10 = smov %s792_s11 }
  0x87   : > { %s1130_s11 = smov %s920_s19  ;;  %s1131_s12 = smov %s800_s13 }
  0x88   : > { %s1132_s13 = smov %s1134_s28  ;;  %18 = sbr.rel (!%p16_p6) target bundleno = 7 (0x7), region = 86 }
  0x8d   :  { %444 = vsyncpa [#allocation3], 1 }
  0x8e   :  { %446 = vsyncpa [#allocation3 + $0x1], 1 }
  0x8f   :  { %447 = vsyncpa [#allocation4], 1 }
  0x90   :  { %449 = vsyncpa [#allocation4 + $0x1], 1 }
  0x91   :  { %450 = vsyncpa [#allocation5], 1 }
  0x92   :  { %452 = vsyncpa [#allocation5 + $0x1], 1 }

</bundles_post_ra>
